<compile_context>
chip_gen: v6e
topology: v6e:2x2x1
jax: 0.10.0
libtpu: 0.0.40
codegen_flags: <defaults>
</compile_context>

<pallas_src>
import functools

import jax
import jax.numpy as jnp
from jax.experimental import pallas as pl
from jax.experimental.pallas import tpu as pltpu

EPS = 1e-07
_LANE = 128


def _focal_kernel(x_ref, y_ref, out_ref, acc_ref, *,
                  gamma, alpha_ratio, eps, count, block_rows, steps):
    p = pl.program_id(0)          # "parallel" core axis
    i = pl.program_id(1)          # "arbitrary" reduction axis

    @pl.when(i == 0)
    def _():
        acc_ref[...] = jnp.zeros_like(acc_ref)

    x = x_ref[...].astype(jnp.float32)
    y = y_ref[...].astype(jnp.float32)

    # Exact reference math (sigmoid -> clip -> two-log BCE), valid for soft y.
    logit = jax.nn.sigmoid(x)
    logit = jnp.clip(logit, eps, 1.0 - eps)
    bce = -(y * jnp.log(logit) + (1.0 - y) * jnp.log(1.0 - logit))
    alpha = alpha_ratio * y + (1.0 - y)
    p_t = logit * y + (1.0 - logit) * (1.0 - y)
    loss = alpha * bce * (1.0 - p_t) ** gamma   # int gamma -> integer power

    # In-kernel pad mask: global element index vs true element count.
    base_row = (p * steps + i) * block_rows
    row_ids = jax.lax.broadcasted_iota(jnp.int32, loss.shape, 0) + base_row
    col_ids = jax.lax.broadcasted_iota(jnp.int32, loss.shape, 1)
    valid = (row_ids * _LANE + col_ids) < count
    acc_ref[...] += jnp.where(valid, loss, 0.0)

    # Per-core partial sum, reduced to a single lane-aligned (8, 128) vreg.
    @pl.when(i == pl.num_programs(1) - 1)
    def _():
        out_ref[0] = acc_ref[...].reshape(block_rows // 8, 8, _LANE).sum(axis=0)


def binary_focal_loss_with_logits(x, y, gamma=2, alpha_ratio=10, eps=EPS,
                                  block_rows=1024, num_cores=2):
    """Pallas implementation of BinaryFocalLossWithLogits.forward -> scalar mean."""
    n = int(x.size)
    rows = -(-n // _LANE)

    # Effective block rows: as large as requested, but never bigger than the
    # per-core share of the data; always a multiple of 8 (sublane tiling).
    br = min(block_rows, max(8, -(-rows // num_cores)))
    br = ((br + 7) // 8) * 8
    steps = -(-rows // (num_cores * br))
    padded_rows = num_cores * steps * br
    pad = padded_rows * _LANE - n

    fx = x.reshape(-1).astype(jnp.float32)
    fy = y.reshape(-1).astype(jnp.float32)
    if pad:                                  # skip the extra HBM pass when aligned
        fx = jnp.pad(fx, (0, pad))
        fy = jnp.pad(fy, (0, pad))
    x2 = fx.reshape(padded_rows, _LANE)
    y2 = fy.reshape(padded_rows, _LANE)

    kernel = functools.partial(
        _focal_kernel,
        gamma=gamma,
        alpha_ratio=float(alpha_ratio),
        eps=float(eps),
        count=n,
        block_rows=br,
        steps=steps,
    )

    partials = pl.pallas_call(
        kernel,
        out_shape=jax.ShapeDtypeStruct((num_cores, 8, _LANE), jnp.float32),
        grid_spec=pltpu.PrefetchScalarGridSpec(
            num_scalar_prefetch=0,
            grid=(num_cores, steps),
            in_specs=[
                pl.BlockSpec((br, _LANE), lambda p, i: (p * steps + i, 0)),
                pl.BlockSpec((br, _LANE), lambda p, i: (p * steps + i, 0)),
            ],
            out_specs=pl.BlockSpec((1, 8, _LANE), lambda p, i: (p, 0, 0)),
            scratch_shapes=[pltpu.VMEM((br, _LANE), jnp.float32)],
        ),
        compiler_params=pltpu.CompilerParams(
            dimension_semantics=("parallel", "arbitrary"),
        ),
    )(x2, y2)

    # Tiny final cross-core reduction + mean normalization in the wrapper.
    return jnp.sum(partials) / n


def _reference(x, y, gamma=2, alpha_ratio=10, eps=EPS):
    x = x.astype(jnp.float32)
    y = y.astype(jnp.float32)
    logit = jnp.clip(jax.nn.sigmoid(x), eps, 1.0 - eps)
    loss = -(y * jnp.log(logit) + (1.0 - y) * jnp.log(1.0 - logit))
    alpha = alpha_ratio * y + (1.0 - y)
    p_t = logit * y + (1.0 - logit) * (1.0 - y)
    return jnp.mean(alpha * loss * (1.0 - p_t) ** gamma)


if __name__ == "__main__":
    key = jax.random.PRNGKey(0)
    kx, ky = jax.random.split(key)
    # NCHW logits and binary targets, as the PyTorch module would receive.
    x = jax.random.normal(kx, (2, 4, 16, 16), dtype=jnp.float32)
    y = jax.random.bernoulli(ky, p=0.3, shape=(2, 4, 16, 16)).astype(jnp.float32)

    loss = binary_focal_loss_with_logits(x, y, gamma=2, alpha_ratio=10, eps=EPS)
    loss = jax.block_until_ready(loss)

    ref = _reference(x, y)
    assert jnp.allclose(loss, ref, rtol=1e-5, atol=1e-6), (loss, ref)
    print("KERNEL_OK")
</pallas_src>

<mosaic_0001>
module attributes {stable_mosaic.version = 11 : i64} {
  func.func @_focal_kernel(%arg0: i32, %arg1: i32, %arg2: memref<8x128xf32, #tpu.memory_space<vmem>>, %arg3: memref<8x128xf32, #tpu.memory_space<vmem>>, %arg4: memref<1x8x128xf32, #tpu.memory_space<vmem>>, %arg5: memref<8x128xf32, #tpu.memory_space<vmem>>) attributes {dimension_semantics = [#tpu.dimension_semantics<parallel>, #tpu.dimension_semantics<arbitrary>], iteration_bounds = array<i64: 2, 1>, scalar_prefetch = 0 : i64, scratch_operands = 1 : i64, tpu.core_type = #tpu.core_type<tc>, window_params = [{transform_indices = @transform_0, window_bounds = array<i64: 8, 128>}, {transform_indices = @transform_1, window_bounds = array<i64: 8, 128>}, {transform_indices = @transform_2, window_bounds = array<i64: 1, 8, 128>}]} {
    %c0_i32 = arith.constant 0 : i32
    %0 = arith.cmpi eq, %arg1, %c0_i32 : i32
    %1 = arith.extui %0 : i1 to i32
    %c0_i32_0 = arith.constant 0 : i32
    %2 = arith.cmpi ne, %1, %c0_i32_0 : i32
    scf.if %2 {
      %cst_21 = arith.constant 0.000000e+00 : f32
      %62 = vector.broadcast %cst_21 : f32 to vector<8x128xf32>
      %c0_22 = arith.constant 0 : index
      %c0_23 = arith.constant 0 : index
      %63 = vector.load %arg5[%c0_22, %c0_23] : memref<8x128xf32, #tpu.memory_space<vmem>>, vector<8x128xf32>
      tpu.vector_store %arg5[%c0_22, %c0_23], %62 {strides = array<i32>} : memref<8x128xf32, #tpu.memory_space<vmem>>, vector<8x128xf32>,
    } else {
    }
    %c0 = arith.constant 0 : index
    %c0_1 = arith.constant 0 : index
    %3 = vector.load %arg2[%c0, %c0_1] : memref<8x128xf32, #tpu.memory_space<vmem>>, vector<8x128xf32>
    %c0_2 = arith.constant 0 : index
    %c0_3 = arith.constant 0 : index
    %4 = vector.load %arg3[%c0_2, %c0_3] : memref<8x128xf32, #tpu.memory_space<vmem>>, vector<8x128xf32>
    %5 = arith.negf %3 : vector<8x128xf32>
    %6 = math.exp %5 : vector<8x128xf32>
    %cst = arith.constant 1.000000e+00 : f32
    %7 = vector.broadcast %cst : f32 to vector<8x128xf32>
    %8 = arith.addf %7, %6 : vector<8x128xf32>
    %9 = arith.divf %7, %8 : vector<8x128xf32>
    %cst_4 = arith.constant 1.000000e-07 : f32
    %cst_5 = arith.constant 0.99999988 : f32
    %10 = vector.broadcast %cst_4 : f32 to vector<8x128xf32>
    %11 = arith.maximumf %10, %9 : vector<8x128xf32>
    %12 = vector.broadcast %cst_5 : f32 to vector<8x128xf32>
    %13 = arith.minimumf %12, %11 : vector<8x128xf32>
    %14 = math.log %13 : vector<8x128xf32>
    %15 = arith.mulf %4, %14 : vector<8x128xf32>
    %cst_6 = arith.constant 1.000000e+00 : f32
    %16 = vector.broadcast %cst_6 : f32 to vector<8x128xf32>
    %17 = arith.subf %16, %4 : vector<8x128xf32>
    %cst_7 = arith.constant 1.000000e+00 : f32
    %18 = vector.broadcast %cst_7 : f32 to vector<8x128xf32>
    %19 = arith.subf %18, %13 : vector<8x128xf32>
    %20 = math.log %19 : vector<8x128xf32>
    %21 = arith.mulf %17, %20 : vector<8x128xf32>
    %22 = arith.addf %15, %21 : vector<8x128xf32>
    %cst_8 = arith.constant 0.000000e+00 : f32
    %23 = vector.broadcast %cst_8 : f32 to vector<8x128xf32>
    %24 = arith.subf %23, %22 : vector<8x128xf32>
    %cst_9 = arith.constant 1.000000e+01 : f32
    %25 = vector.broadcast %cst_9 : f32 to vector<8x128xf32>
    %26 = arith.mulf %25, %4 : vector<8x128xf32>
    %cst_10 = arith.constant 1.000000e+00 : f32
    %27 = vector.broadcast %cst_10 : f32 to vector<8x128xf32>
    %28 = arith.subf %27, %4 : vector<8x128xf32>
    %29 = arith.addf %26, %28 : vector<8x128xf32>
    %30 = arith.mulf %13, %4 : vector<8x128xf32>
    %cst_11 = arith.constant 1.000000e+00 : f32
    %31 = vector.broadcast %cst_11 : f32 to vector<8x128xf32>
    %32 = arith.subf %31, %13 : vector<8x128xf32>
    %cst_12 = arith.constant 1.000000e+00 : f32
    %33 = vector.broadcast %cst_12 : f32 to vector<8x128xf32>
    %34 = arith.subf %33, %4 : vector<8x128xf32>
    %35 = arith.mulf %32, %34 : vector<8x128xf32>
    %36 = arith.addf %30, %35 : vector<8x128xf32>
    %37 = arith.mulf %29, %24 : vector<8x128xf32>
    %cst_13 = arith.constant 1.000000e+00 : f32
    %38 = vector.broadcast %cst_13 : f32 to vector<8x128xf32>
    %39 = arith.subf %38, %36 : vector<8x128xf32>
    %40 = arith.mulf %39, %39 : vector<8x128xf32>
    %41 = arith.mulf %37, %40 : vector<8x128xf32>
    %c1_i32 = arith.constant 1 : i32
    %42 = arith.muli %arg0, %c1_i32 : i32
    %43 = arith.addi %42, %arg1 : i32
    %c8_i32 = arith.constant 8 : i32
    %44 = arith.muli %43, %c8_i32 : i32
    %45 = tpu.iota {dimensions = array<i32: 0>} : vector<8x128xi32>
    %46 = vector.broadcast %44 : i32 to vector<8x128xi32>
    %47 = arith.addi %45, %46 : vector<8x128xi32>
    %48 = tpu.iota {dimensions = array<i32: 1>} : vector<8x128xi32>
    %c128_i32 = arith.constant 128 : i32
    %49 = vector.broadcast %c128_i32 : i32 to vector<8x128xi32>
    %50 = arith.muli %47, %49 : vector<8x128xi32>
    %51 = arith.addi %50, %48 : vector<8x128xi32>
    %c2048_i32 = arith.constant 2048 : i32
    %52 = vector.broadcast %c2048_i32 : i32 to vector<8x128xi32>
    %53 = arith.cmpi slt, %51, %52 : vector<8x128xi32>
    %c0_14 = arith.constant 0 : index
    %c0_15 = arith.constant 0 : index
    %54 = vector.load %arg5[%c0_14, %c0_15] : memref<8x128xf32, #tpu.memory_space<vmem>>, vector<8x128xf32>
    %cst_16 = arith.constant 0.000000e+00 : f32
    %55 = vector.broadcast %cst_16 : f32 to vector<8x128xf32>
    %56 = arith.select %53, %41, %55 : vector<8x128xi1>, vector<8x128xf32>
    %57 = arith.addf %54, %56 : vector<8x128xf32>
    %c0_17 = arith.constant 0 : index
    %c0_18 = arith.constant 0 : index
    %58 = vector.load %arg5[%c0_17, %c0_18] : memref<8x128xf32, #tpu.memory_space<vmem>>, vector<8x128xf32>
    tpu.vector_store %arg5[%c0_17, %c0_18], %57 {strides = array<i32>} : memref<8x128xf32, #tpu.memory_space<vmem>>, vector<8x128xf32>,
    %c0_i32_19 = arith.constant 0 : i32
    %59 = arith.cmpi eq, %arg1, %c0_i32_19 : i32
    %60 = arith.extui %59 : i1 to i32
    %c0_i32_20 = arith.constant 0 : i32
    %61 = arith.cmpi ne, %60, %c0_i32_20 : i32
    scf.if %61 {
      %c0_21 = arith.constant 0 : index
      %c0_22 = arith.constant 0 : index
      %62 = vector.load %arg5[%c0_21, %c0_22] : memref<8x128xf32, #tpu.memory_space<vmem>>, vector<8x128xf32>
      %63 = vector.shape_cast %62 : vector<8x128xf32> to vector<1x8x128xf32>
      %cst_23 = arith.constant dense<0.000000e+00> : vector<8x128xf32>
      %64 = vector.multi_reduction <add>, %63, %cst_23 [0] : vector<1x8x128xf32> to vector<8x128xf32>
      %c0_24 = arith.constant 0 : index
      %c0_25 = arith.constant 0 : index
      %c0_26 = arith.constant 0 : index
      %65 = vector.load %arg4[%c0_24, %c0_25, %c0_26] : memref<1x8x128xf32, #tpu.memory_space<vmem>>, vector<1x8x128xf32>
      %66 = vector.shape_cast %65 : vector<1x8x128xf32> to vector<8x128xf32>
      %67 = vector.shape_cast %64 : vector<8x128xf32> to vector<1x8x128xf32>
      tpu.vector_store %arg4[%c0_24, %c0_25, %c0_26], %67 {strides = array<i32>} : memref<1x8x128xf32, #tpu.memory_space<vmem>>, vector<1x8x128xf32>,
    } else {
    }
    return
  }
  func.func @transform_0(%arg0: i32, %arg1: i32) -> (i32, i32) {
    %c1_i32 = arith.constant 1 : i32
    %0 = arith.muli %arg0, %c1_i32 : i32
    %1 = arith.addi %0, %arg1 : i32
    %c0_i32 = arith.constant 0 : i32
    %c0_i32_0 = arith.constant 0 : i32
    return %1, %c0_i32 : i32, i32
  }
  func.func @transform_1(%arg0: i32, %arg1: i32) -> (i32, i32) {
    %c1_i32 = arith.constant 1 : i32
    %0 = arith.muli %arg0, %c1_i32 : i32
    %1 = arith.addi %0, %arg1 : i32
    %c0_i32 = arith.constant 0 : i32
    %c0_i32_0 = arith.constant 0 : i32
    return %1, %c0_i32 : i32, i32
  }
  func.func @transform_2(%arg0: i32, %arg1: i32) -> (i32, i32, i32) {
    %c0_i32 = arith.constant 0 : i32
    %c0_i32_0 = arith.constant 0 : i32
    %c0_i32_1 = arith.constant 0 : i32
    return %arg0, %c0_i32, %c0_i32_0 : i32, i32, i32
  }
}

</mosaic_0001>

<bundles_post_ra>
// kernel: tpu_custom_call.1
= control target key start
LH: loop header
LB: loop body
LE: loop exit
PB: predicated region body
PF: predicated region fallthrough
CT: control target
= control target key end

     0   :  { %7 = vsyncpa [#allocation4], 0  ;;  %s814_s0 = inlined_call_operand.hbm [shape: f32[16,128], index: 0, kind: input, shape index: {}]   ;;  %s815_s1 = inlined_call_operand.hbm [shape: f32[16,128], index: 1, kind: input, shape index: {}]   ;;  %s816_s2 = inlined_call_operand.hbm [shape: f32[2,8,128], index: 2, kind: output, shape index: {}]  }
   0x1   :  { %9 = vsyncpa [#allocation4 + $0x1], 0 }
   0x2   :  { %10 = vsyncpa [#allocation7], 0 }
   0x3   :  { %12 = vsyncpa [#allocation7 + $0x1], 0 }
   0x4   :  { %13 = vsyncpa [#allocation5], 0 }
   0x5   :  { %15 = vsyncpa [#allocation5 + $0x1], 0  ;;  %s641_s9 = smov 0   ;;  %s643_s10 = smov 0  }
   0x6   :  { %s645_s11 = smov 0   ;;  %s647_s12 = smov 0  }
   0x7   :  { %s649_s13 = smov 0   ;;  %s651_s14 = smov 0  }
   0x8 LB: > { %s388_s15 = sadd.s32 4294967295, %s621_s14   ;;  %s389_s16 = sadd.s32 4294967294, %s621_s14   ;;  %s621_s14 = sphi %s651_s14, %s21_s14   ;;  %s617_s13 = sphi %s649_s13, %s828_s13   ;;  %s613_s12 = sphi %s647_s12, %s827_s12   ;;  %s609_s11 = sphi %s645_s11, %s826_s11   ;;  %s605_s10 = sphi %s643_s10, %s825_s10   ;;  %s601_s9 = sphi %s641_s9, %s824_s9  }
   0x9   : > { %s33_s17 = sadd.s32 1, %s617_s13  ;;  %s42_s18 = sadd.s32 1, %s609_s11 }
   0xa   : > { %p35_p0 = scmp.ge.s32.totalorder %s33_s17, 2  ;;  %p49_p1 = scmp.ne.s32.totalorder %s609_s11, %s605_s10 }
   0xb   : > { %p50_p2 = scmp.eq.s32.totalorder %s621_s14, 0  ;;  %p55_p3 = scmp.ne.s32.totalorder %s605_s10, %s601_s9 }
   0xc   : > { %s830_s17 = smov (%p35_p0, %s33_s17), 0  ;;  %p56_p5 = scmp.eq.s32.totalorder %s388_s15, 0 }
   0xd   : > { %p682_p4 = por %p50_p2, %p49_p1  ;;  %s39_s20 = ssub.s32 %s617_s13, %s830_s17 }
   0xe   : > { %p107_p6 = scmp.eq.s32.totalorder %s388_s15, 1  ;;  %p40_p7 = scmp.eq.s32.totalorder %s39_s20, 0 }
   0xf   : > { %p688_p8 = por %p56_p5, %p55_p3  ;;  %p113_p10 = scmp.eq.s32.totalorder %s389_s16, 1 }
  0x10   : > { %p692_p9 = por %p107_p6, %p49_p1  ;;  %p423_p13 = scmp.lt.s32.totalorder %s621_s14, 2 }
  0x11   : > { %s697_s23 = scalar_select %p40_p7, %s609_s11, %s42_s18  }
  0x12   : > { %p699_p11 = por %p113_p10, %p55_p3  ;;  %s706_s25 = sand.u32 1, %s609_s11  }
  0x13   : > { %s392_s26 = sshll.u32 %s706_s25, 3  ;;  %s393_s27 = sshll.u32 %s617_s13, 7 }
  0x14   : > { %s143_s30 = scalar_lea.hbm %s814_s0, %s393_s27  ;;  %s137_s3 = scalar_lea.vmem [#allocation3], %s392_s26 }
  0x15   : > { %s145_s4 = sshll.u32 %s137_s3, 4  ;;  %p715_p0 = pnand %p423_p13, %p682_p4  ;;  %s146_s4 = int_to_ptr.vmem [resolvable:$true] %s145_s4 }
  0x16   : > { %p396_p1 = scmp.ge.s32.totalorder %s621_s14, 1  ;;  %p169_p2 = scmp.lt.s32.totalorder %s621_s14, 3 }
  0x17   : > { %s134_s6 = scalar_lea.sflag [#allocation4], %s706_s25  ;;  %p483_p3 = pneg %p715_p0 }
  0x18   : > { %s494_s7 = scalar_lea.vmem %s146_s4, 128  ;;  %s623_s8 = smov [#allocation3]  }
  0x19   : > { %p495_p5 = scmp.ne.s32.totalorder %s146_s4, %s494_s7  ;;  %s499_s15 = sshll.u32 %s623_s8, 4  ;;  %s500_s15 = int_to_ptr.vmem [resolvable:$false] %s499_s15 }
  0x1a   : > { %s501_s16 = scalar_lea.vmem %s500_s15, 256  ;;  %p502_p4 = scmp.lt.s32.totalorder %s146_s4, %s500_s15 }
  0x1b   : > { %p497_p6 = pnand %p495_p5, %p483_p3  ;;  %p503_p10 = scmp.lt.s32.totalorder %s501_s16, %s494_s7 }
  0x1d   : > { %p498_p7 = pneg %p497_p6  ;;  %p504_p13 = por %p503_p10, %p502_p4 }
  0x1f   : > { %p505_p12 = pnand %p504_p13, %p498_p7 }
  0x21   : > { %508 = shalt.err (!%p505_p12)
}
  0x22   : > { %415 = dma.hbm_to_vmem [thread:$0]  (!%p715_p0), %s143_s30, 128, %s146_s4, %s134_s6  }
  0x23   : > { %p733_p5 = pnand %p396_p1, %p169_p2  ;;  %s162_s28 = scalar_lea.hbm %s815_s1, %s393_s27 }
  0x24   : > { %s156_s29 = scalar_lea.vmem [#allocation6], %s392_s26  ;;  %s153_s7 = scalar_lea.sflag [#allocation7], %s706_s25 }
  0x25   : > { %s164_s3 = sshll.u32 %s156_s29, 4  ;;  %s624_s30 = smov [#allocation6]   ;;  %s165_s3 = int_to_ptr.vmem [resolvable:$true] %s164_s3 }
  0x26   : > { %s522_s8 = scalar_lea.vmem %s165_s3, 128  ;;  %s527_s4 = sshll.u32 %s624_s30, 4  ;;  %s528_s4 = int_to_ptr.vmem [resolvable:$false] %s527_s4 }
  0x27   : > { %p523_p12 = scmp.ne.s32.totalorder %s165_s3, %s522_s8  ;;  %s529_s6 = scalar_lea.vmem %s528_s4, 256 }
  0x28   : > { %p530_p1 = scmp.lt.s32.totalorder %s165_s3, %s528_s4  ;;  %p531_p2 = scmp.lt.s32.totalorder %s529_s6, %s522_s8 }
  0x29   : > { %p525_p6 = pnand %p523_p12, %p483_p3 }
  0x2a   : > { %p532_p4 = por %p531_p2, %p530_p1 }
  0x2b   : > { %p526_p7 = pneg %p525_p6 }
  0x2d   : > { %p533_p10 = pnand %p532_p4, %p526_p7 }
  0x2f   : > { %536 = shalt.err (!%p533_p10)
}
  0x30   : > { %418 = dma.hbm_to_vmem [thread:$0]  (!%p715_p0), %s162_s28, 128, %s165_s3, %s153_s7  }
  0x31   : > { %173 = sbr.rel (%p733_p5) target bundleno = 136 (0x88), region = 28  ;;  %s749_s25 = sand.u32 (!%p733_p5), 1, %s605_s10  }
  0x32   : > { %s752_s26 = sshll.u32 (!%p733_p5), %s749_s25, 3  ;;  %s176_s27 = scalar_lea.sflag (!%p733_p5), [#allocation4], %s749_s25 }
  0x33   : > { %s179_s15 = scalar_lea.vmem (!%p733_p5), [#allocation3], %s752_s26 }
  0x36   : > { %588 = dma.done.wait (%p688_p8), %s176_s27, 128  }
  0x37   : > { %590 = vsyncadd (%p688_p8), %s176_s27, 4294967168  ;;  %s185_s5 = scalar_lea.sflag [#allocation7], %s749_s25  ;;  %s188_s16 = scalar_lea.vmem [#allocation6], %s752_s26 }
  0x38   : > { %592 = dma.done.wait (%p688_p8), %s185_s5, 128  }
  0x39   : > { %594 = vsyncadd (%p688_p8), %s185_s5, 4294967168  ;;  %v221_v0 = vld [vmem:[%s179_s15] sm:$0xff]  ;;  %v222_v8 = vld [vmem:[%s188_s16] sm:$0xff]  ;;  %v252_v9 = vlaneseq  ;;  %s401_s18 = sshll.u32 %s613_s12, 3  ;;  %s213_s21 = scalar_lea.vmem [#allocation8], %s752_s26 }
  0x3a   : > { %v400_v1 = vmul.f32 -1.442695, %v221_v0  ;;  %v234_v10 = vsub.f32 1.0, %v222_v8  ;;  %v254_v14 = vstv %s401_s18  ;;  %v241_v22 = vmul.f32 10.0, %v222_v8  ;;  %s285_s19 = sshll.u32 %s213_s21, 4  ;;  %s403_s20 = sshll.u32 %s613_s12, 7  ;;  %s769_s19 = int_to_ptr.vmem [resolvable:$true] %s285_s19 }
  0x3b   : > { %v253_v11 = vshrl.u32 %v252_v9, 7  ;;  %v257_v23 = vand.u32 127, %v252_v9  ;;  %s283_s3 = scalar_lea.hbm %s816_s2, %s403_s20  ;;  %s272_s7 = scalar_lea.sflag [#allocation5], %s749_s25 }
  0x3c   : > { %473 = vpow2.f32 %v400_v1  ;;  %v242_v28 = vadd.f32 %v241_v22, %v234_v10  ;;  %s537_s8 = scalar_lea.vmem %s769_s19, 128  ;;  %s625_s12 = smov [#allocation8]  }
  0x3d   : > { %v255_v16 = vadd.s32 %v254_v14, %v253_v11  ;;  %p538_p8 = scmp.ne.s32.totalorder %s769_s19, %s537_s8  ;;  %s541_s30 = sshll.u32 %s625_s12, 4  ;;  %s542_s30 = int_to_ptr.vmem [resolvable:$false] %s541_s30 }
  0x3e   : > { %s543_s4 = scalar_lea.vmem %s542_s30, 256  ;;  %p544_p13 = scmp.lt.s32.totalorder %s769_s19, %s542_s30 }
  0x3f   : > { %v258_v24 = vmul.u32 128, %v255_v16  ;;  %p539_p0 = pnand %p538_p8, %p692_p9  ;;  %p545_p5 = scmp.lt.s32.totalorder %s543_s4, %s537_s8 }
  0x41   : > { %v259_v29 = vadd.s32 %v258_v24, %v257_v23  ;;  %p540_p3 = pneg %p539_p0  ;;  %p546_p12 = por %p545_p5, %p544_p13 }
  0x43   : > { %vm260_vm0 = vcmp.lt.s32.totalorder %v259_v29, 2048  ;;  %p547_p6 = pnand %p546_p12, %p540_p3 }
  0x49   : > { %v474_v2 = vpop.eup %473 }
  0x4a   : > { %v226_v3 = vadd.f32 1.0, %v474_v2 }
  0x4c   : > { %475 = vrcp.f32 %v226_v3 }
  0x59   : > { %v476_v4 = vpop.eup %475 }
  0x5a   : > { %v229_v5 = vmax.f32 %v476_v4, 1e-07 }
  0x5c   : > { %v230_v6 = vmin.f32 %v229_v5, 0.9999999 }
  0x5e   : > { %477 = vlog2.f32 %v230_v6  ;;  %v235_v7 = vsub.f32 1.0, %v230_v6  ;;  %v243_v12 = vmul.f32 %v230_v6, %v222_v8 }
  0x60   : > { %479 = vlog2.f32 %v235_v7  ;;  %v244_v13 = vmul.f32 %v235_v7, %v234_v10 }
  0x62   : > { %v245_v18 = vadd.f32 %v244_v13, %v243_v12 }
  0x64   : > { %v247_v26 = vsub.f32 1.0, %v245_v18 }
  0x66   : > { %v248_v31 = vmul.f32 %v247_v26, %v247_v26 }
  0x6b   : > { %v478_v15 = vpop.eup %477 }
  0x6c   : > { %v232_v17 = vmul.f32 0.6931472, %v478_v15 }
  0x6d   : > { %v480_v19 = vpop.eup %479 }
  0x6e   : > { %v233_v20 = vmul.f32 %v232_v17, %v222_v8  ;;  %v237_v21 = vmul.f32 0.6931472, %v480_v19 }
  0x70   : > { %v238_v25 = vmul.f32 %v237_v21, %v234_v10 }
  0x72   : > { %v239_v27 = vadd.f32 %v238_v25, %v233_v20 }
  0x74   : > { %v240_v30 = vsub.f32 0.0, %v239_v27 }
  0x76   : > { %v246_v32 = vmul.f32 %v242_v28, %v240_v30 }
  0x78   : > { %v249_v33 = vmul.f32 %v248_v31, %v246_v32 }
  0x7a   : > { %v262_v34 = vsel %vm260_vm0, %v249_v33, 0.0 }
  0x7b   : > { %270 = vst [vmem:[%s213_s21] sm:$0xff] %v262_v34 }
  0x7c   : > { %550 = shalt.err (!%p547_p6)
}
  0x7d   : > { %s551_s6 = scalar_lea.hbm %s283_s3, 128  ;;  %s555_s27 = scalar_lea.hbm %s816_s2, 256 }
  0x7e   : > { %p552_p7 = scmp.ne.s32.totalorder %s283_s3, %s551_s6  ;;  %p556_p4 = scmp.lt.s32.totalorder %s283_s3, %s816_s2 }
  0x7f   : > { %p557_p10 = scmp.lt.s32.totalorder %s555_s27, %s551_s6 }
  0x80   : > { %p553_p1 = pnand %p552_p7, %p692_p9 }
  0x81   : > { %p558_p8 = por %p557_p10, %p556_p4 }
  0x82   : > { %p554_p2 = pneg %p553_p1 }
  0x84   : > { %p559_p0 = pnand %p558_p8, %p554_p2 }
  0x86   : > { %562 = shalt.err (!%p559_p0)
}
  0x87   : > { %410 = dma.vmem_to_hbm [thread:$0]  (%p692_p9), %s769_s19, 128, %s283_s3, %s272_s7  }
  0x88 PF: > { %s297_s16 = sand.u32 1, %s601_s9   ;;  %p823_p3 = scmp.ge.s32.totalorder %s621_s14, 2 }
  0x89   : > { %s298_s18 = scalar_lea.sflag [#allocation5], %s297_s16 }
  0x8a   : > { %p420_p13 = pnand %p823_p3, %p699_p11 }
  0x8c   : > { %p421_p5 = pneg %p420_p13 }
  0x8e   : > { %596 = dma.done.wait (%p421_p5), %s298_s18, 128  }
  0x8f   : > { %598 = vsyncadd (%p421_p5), %s298_s18, 4294967168  ;;  %s21_s14 = sadd.s32 1, %s621_s14   ;;  %s824_s9 = smov %s605_s10 }
  0x90   : > { %p18_p12 = scmp.ge.s32.totalorder %s21_s14, 4   ;;  %s825_s10 = smov %s609_s11 }
  0x91   : > { %s826_s11 = smov %s697_s23  ;;  %s827_s12 = smov %s617_s13 }
  0x92   : > { %s828_s13 = smov %s830_s17  ;;  %20 = sbr.rel (!%p18_p12) target bundleno = 8 (0x8), region = 94 }
  0x97   :  { %303 = vsyncpa [#allocation4], 1 }
  0x98   :  { %305 = vsyncpa [#allocation4 + $0x1], 1 }
  0x99   :  { %306 = vsyncpa [#allocation7], 1 }
  0x9a   :  { %308 = vsyncpa [#allocation7 + $0x1], 1 }
  0x9b   :  { %309 = vsyncpa [#allocation5], 1 }
  0x9c   :  { %311 = vsyncpa [#allocation5 + $0x1], 1 }

</bundles_post_ra>
